<compile_context>
chip_gen: v7x
topology: tpu7x:2x2x1
jax: 0.10.0
libtpu: 0.0.40
codegen_flags: <defaults>
</compile_context>

<pallas_src>
import jax
import jax.numpy as jnp
import numpy as np
from jax.experimental import pallas as pl
from jax.experimental.pallas import tpu as pltpu

EPS = 1e-06

BLADE_GRADE = (0, 1, 1, 1, 2, 2, 2, 3)   # grade of each blade
SUBSPACES = (1, 3, 3, 1)                 # blades per grade
N_SUBSPACES = len(SUBSPACES)
DIM = len(BLADE_GRADE)


def _normalization_kernel(x_ref, s_ref, o_ref):
    x = x_ref[...].astype(jnp.float32)      # (TILE_B, TILE_L)
    s_a = s_ref[...].astype(jnp.float32)    # (1, TILE_L) sigmoid(a), blade-expanded
    y = x * x

    tl = x.shape[-1]
    lane = jax.lax.broadcasted_iota(jnp.int32, (1, tl), 1)
    d = lane % DIM                          # blade index of each lane

    def grade(b):
        return ((b > 0).astype(jnp.int32) + (b > 3).astype(jnp.int32)
                + (b > 6).astype(jnp.int32))

    g = grade(d)

    # q[l] = sum of x^2 over blades of the same grade within the same
    # multivector.  Same-grade neighbours sit at lane offsets in {-2,-1,+1,+2};
    # multivector boundaries are multiples of 8 (and 8 | TILE_L), so any
    # roll wrap-around is always masked off.
    q = y
    for off in (-2, -1, 1, 2):
        dn = d + off
        ok = (dn >= 0) & (dn <= DIM - 1) & (g == grade(dn))
        shifted = jnp.roll(y, shift=-off, axis=-1)   # shifted[l] = y[l + off]
        q = q + jnp.where(ok, shifted, 0.0)

    norms = jnp.sqrt(jnp.abs(q))                     # per-blade, grade-repeated
    denom = s_a * (norms - 1.0) + 1.0 + EPS
    o_ref[...] = (x * pl.reciprocal(denom, approx=False)).astype(o_ref.dtype)


def _choose_tiles(batch, lanes):
    # Lane tile: a multiple of 128 that divides `lanes`, capped at 2048 lanes.
    m = lanes // 128
    k = 1
    for cand in range(1, min(m, 16) + 1):
        if m % cand == 0:
            k = cand
    tile_l = 128 * k
    # Row tile: target ~512 KiB of f32 per input buffer.
    target_rows = max(1, (512 * 1024 // 4) // tile_l)
    if target_rows >= batch:
        tile_b = batch                        # full dim (allowed even if <8)
    else:
        tile_b = max(8, (target_rows // 8) * 8)
    return tile_b, tile_l


@jax.jit
def normalization_layer(x, a):
    """x: (B, F, 8) multivectors; a: (F, 4) per-feature / per-grade parameter."""
    B, F, D = x.shape
    assert D == DIM and a.shape == (F, N_SUBSPACES)

    # Precompute sigmoid(a) once and expand to per-blade width (F, 8).
    s_a = jax.nn.sigmoid(a.astype(jnp.float32))
    s_full = jnp.repeat(s_a, np.array(SUBSPACES), axis=-1, total_repeat_length=DIM)

    # Pad features so the flattened lane width F*8 is a multiple of 128.
    f_pad = ((F + 15) // 16) * 16
    if f_pad != F:
        x = jnp.pad(x, ((0, 0), (0, f_pad - F), (0, 0)))
        s_full = jnp.pad(s_full, ((0, f_pad - F), (0, 0)))
    lanes = f_pad * DIM

    x2 = x.reshape(B, lanes)           # free: merges contiguous trailing dims
    s2 = s_full.reshape(1, lanes)

    tile_b, tile_l = _choose_tiles(B, lanes)
    grid = (pl.cdiv(B, tile_b), lanes // tile_l)

    out = pl.pallas_call(
        _normalization_kernel,
        out_shape=jax.ShapeDtypeStruct((B, lanes), x.dtype),
        grid=grid,
        in_specs=[
            pl.BlockSpec((tile_b, tile_l), lambda i, j: (i, j)),
            pl.BlockSpec((1, tile_l), lambda i, j: (0, j)),
        ],
        out_specs=pl.BlockSpec((tile_b, tile_l), lambda i, j: (i, j)),
        compiler_params=pltpu.CompilerParams(
            dimension_semantics=("parallel", "parallel")),
    )(x2, s2)

    out = out.reshape(B, f_pad, DIM)
    if f_pad != F:
        out = out[:, :F, :]
    return out


def _reference(x, a):
    """Pure-JAX mirror of the PyTorch forward for verification."""
    x = x.astype(jnp.float32)
    parts, off = [], 0
    for s in SUBSPACES:
        comp = x[..., off:off + s]
        q = jnp.sum(comp * comp, axis=-1, keepdims=True)
        parts.append(jnp.sqrt(jnp.abs(q)))
        off += s
    norms = jnp.concatenate(parts, axis=-1)                      # (B, F, 4)
    s_a = jax.nn.sigmoid(a.astype(jnp.float32))
    norms = s_a * (norms - 1.0) + 1.0
    norms = jnp.repeat(norms, np.array(SUBSPACES), axis=-1,
                       total_repeat_length=DIM)                  # (B, F, 8)
    return x / (norms + EPS)


if __name__ == "__main__":
    key = jax.random.PRNGKey(0)
    init = 0.25

    # toy case / feature-padding case / multi-row-tile case
    for (B, F) in ((2, 4), (16, 20), (2048, 16)):
        kx, key = jax.random.split(key)
        x = jax.random.normal(kx, (B, F, DIM), dtype=jnp.float32)
        a = jnp.zeros((F, N_SUBSPACES), jnp.float32) + init
        out = jax.block_until_ready(normalization_layer(x, a))
        ref = _reference(x, a)
        np.testing.assert_allclose(np.asarray(out), np.asarray(ref),
                                   rtol=1e-5, atol=1e-5)
    print("KERNEL_OK")
</pallas_src>

<mosaic_0001>
module attributes {stable_mosaic.version = 11 : i64} {
  func.func @_normalization_kernel(%arg0: i32, %arg1: i32, %arg2: memref<2x128xf32, #tpu.memory_space<vmem>>, %arg3: memref<1x128xf32, #tpu.memory_space<vmem>>, %arg4: memref<2x128xf32, #tpu.memory_space<vmem>>) attributes {dimension_semantics = [#tpu.dimension_semantics<parallel>, #tpu.dimension_semantics<parallel>], iteration_bounds = array<i64: 1, 1>, scalar_prefetch = 0 : i64, scratch_operands = 0 : i64, tpu.core_type = #tpu.core_type<tc>, window_params = [{transform_indices = @transform_0, window_bounds = array<i64: 2, 128>}, {transform_indices = @transform_1, window_bounds = array<i64: 1, 128>}, {transform_indices = @transform_2, window_bounds = array<i64: 2, 128>}]} {
    %c0 = arith.constant 0 : index
    %c0_0 = arith.constant 0 : index
    %0 = vector.load %arg2[%c0, %c0_0] : memref<2x128xf32, #tpu.memory_space<vmem>>, vector<2x128xf32>
    %c0_1 = arith.constant 0 : index
    %c0_2 = arith.constant 0 : index
    %1 = vector.load %arg3[%c0_1, %c0_2] : memref<1x128xf32, #tpu.memory_space<vmem>>, vector<1x128xf32>
    %2 = arith.mulf %0, %0 : vector<2x128xf32>
    %3 = tpu.iota {dimensions = array<i32: 1>} : vector<1x128xi32>
    %c8_i32 = arith.constant 8 : i32
    %c0_i32 = arith.constant 0 : i32
    %4 = arith.cmpi eq, %c8_i32, %c0_i32 : i32
    %c1_i32 = arith.constant 1 : i32
    %5 = arith.select %4, %c1_i32, %c8_i32 : i32
    %6 = vector.broadcast %5 : i32 to vector<1x128xi32>
    %7 = arith.remsi %3, %6 : vector<1x128xi32>
    %c0_i32_3 = arith.constant 0 : i32
    %8 = vector.broadcast %c0_i32_3 : i32 to vector<1x128xi32>
    %9 = arith.cmpi ne, %7, %8 : vector<1x128xi32>
    %c0_i32_4 = arith.constant 0 : i32
    %10 = vector.broadcast %c0_i32_4 : i32 to vector<1x128xi32>
    %11 = arith.cmpi slt, %7, %10 : vector<1x128xi32>
    %c0_i32_5 = arith.constant 0 : i32
    %12 = arith.cmpi slt, %5, %c0_i32_5 : i32
    %13 = vector.broadcast %12 : i1 to vector<1x128xi1>
    %14 = vector.broadcast %13 : vector<1x128xi1> to vector<1x128xi1>
    %15 = arith.xori %11, %14 : vector<1x128xi1>
    %16 = arith.andi %15, %9 : vector<1x128xi1>
    %17 = vector.broadcast %5 : i32 to vector<1x128xi32>
    %18 = arith.addi %7, %17 : vector<1x128xi32>
    %19 = arith.select %16, %18, %7 : vector<1x128xi1>, vector<1x128xi32>
    %c0_i32_6 = arith.constant 0 : i32
    %20 = vector.broadcast %c0_i32_6 : i32 to vector<1x128xi32>
    %21 = arith.cmpi sgt, %19, %20 : vector<1x128xi32>
    %22 = arith.extui %21 : vector<1x128xi1> to vector<1x128xi32>
    %c3_i32 = arith.constant 3 : i32
    %23 = vector.broadcast %c3_i32 : i32 to vector<1x128xi32>
    %24 = arith.cmpi sgt, %19, %23 : vector<1x128xi32>
    %25 = arith.extui %24 : vector<1x128xi1> to vector<1x128xi32>
    %26 = arith.addi %22, %25 : vector<1x128xi32>
    %c6_i32 = arith.constant 6 : i32
    %27 = vector.broadcast %c6_i32 : i32 to vector<1x128xi32>
    %28 = arith.cmpi sgt, %19, %27 : vector<1x128xi32>
    %29 = arith.extui %28 : vector<1x128xi1> to vector<1x128xi32>
    %30 = arith.addi %26, %29 : vector<1x128xi32>
    %c-2_i32 = arith.constant -2 : i32
    %31 = vector.broadcast %c-2_i32 : i32 to vector<1x128xi32>
    %32 = arith.addi %19, %31 : vector<1x128xi32>
    %c0_i32_7 = arith.constant 0 : i32
    %33 = vector.broadcast %c0_i32_7 : i32 to vector<1x128xi32>
    %34 = arith.cmpi sge, %32, %33 : vector<1x128xi32>
    %c7_i32 = arith.constant 7 : i32
    %35 = vector.broadcast %c7_i32 : i32 to vector<1x128xi32>
    %36 = arith.cmpi sle, %32, %35 : vector<1x128xi32>
    %37 = arith.andi %34, %36 : vector<1x128xi1>
    %c0_i32_8 = arith.constant 0 : i32
    %38 = vector.broadcast %c0_i32_8 : i32 to vector<1x128xi32>
    %39 = arith.cmpi sgt, %32, %38 : vector<1x128xi32>
    %40 = arith.extui %39 : vector<1x128xi1> to vector<1x128xi32>
    %c3_i32_9 = arith.constant 3 : i32
    %41 = vector.broadcast %c3_i32_9 : i32 to vector<1x128xi32>
    %42 = arith.cmpi sgt, %32, %41 : vector<1x128xi32>
    %43 = arith.extui %42 : vector<1x128xi1> to vector<1x128xi32>
    %44 = arith.addi %40, %43 : vector<1x128xi32>
    %c6_i32_10 = arith.constant 6 : i32
    %45 = vector.broadcast %c6_i32_10 : i32 to vector<1x128xi32>
    %46 = arith.cmpi sgt, %32, %45 : vector<1x128xi32>
    %47 = arith.extui %46 : vector<1x128xi1> to vector<1x128xi32>
    %48 = arith.addi %44, %47 : vector<1x128xi32>
    %49 = arith.cmpi eq, %30, %48 : vector<1x128xi32>
    %50 = arith.andi %37, %49 : vector<1x128xi1>
    %51 = vector.extract_strided_slice %2 {offsets = [0, 126], sizes = [2, 2], strides = [1, 1]} : vector<2x128xf32> to vector<2x2xf32>
    %52 = vector.extract_strided_slice %2 {offsets = [0, 0], sizes = [2, 126], strides = [1, 1]} : vector<2x128xf32> to vector<2x126xf32>
    %53 = tpu.concatenate %51, %52 in 1 : vector<2x2xf32>, vector<2x126xf32> -> vector<2x128xf32>
    %cst = arith.constant 0.000000e+00 : f32
    %54 = vector.shape_cast %50 : vector<1x128xi1> to vector<1x128xi1>
    %55 = vector.broadcast %54 : vector<1x128xi1> to vector<2x128xi1>
    %56 = vector.broadcast %cst : f32 to vector<2x128xf32>
    %57 = arith.select %55, %53, %56 : vector<2x128xi1>, vector<2x128xf32>
    %58 = arith.addf %2, %57 : vector<2x128xf32>
    %c-1_i32 = arith.constant -1 : i32
    %59 = vector.broadcast %c-1_i32 : i32 to vector<1x128xi32>
    %60 = arith.addi %19, %59 : vector<1x128xi32>
    %c0_i32_11 = arith.constant 0 : i32
    %61 = vector.broadcast %c0_i32_11 : i32 to vector<1x128xi32>
    %62 = arith.cmpi sge, %60, %61 : vector<1x128xi32>
    %c7_i32_12 = arith.constant 7 : i32
    %63 = vector.broadcast %c7_i32_12 : i32 to vector<1x128xi32>
    %64 = arith.cmpi sle, %60, %63 : vector<1x128xi32>
    %65 = arith.andi %62, %64 : vector<1x128xi1>
    %c0_i32_13 = arith.constant 0 : i32
    %66 = vector.broadcast %c0_i32_13 : i32 to vector<1x128xi32>
    %67 = arith.cmpi sgt, %60, %66 : vector<1x128xi32>
    %68 = arith.extui %67 : vector<1x128xi1> to vector<1x128xi32>
    %c3_i32_14 = arith.constant 3 : i32
    %69 = vector.broadcast %c3_i32_14 : i32 to vector<1x128xi32>
    %70 = arith.cmpi sgt, %60, %69 : vector<1x128xi32>
    %71 = arith.extui %70 : vector<1x128xi1> to vector<1x128xi32>
    %72 = arith.addi %68, %71 : vector<1x128xi32>
    %c6_i32_15 = arith.constant 6 : i32
    %73 = vector.broadcast %c6_i32_15 : i32 to vector<1x128xi32>
    %74 = arith.cmpi sgt, %60, %73 : vector<1x128xi32>
    %75 = arith.extui %74 : vector<1x128xi1> to vector<1x128xi32>
    %76 = arith.addi %72, %75 : vector<1x128xi32>
    %77 = arith.cmpi eq, %30, %76 : vector<1x128xi32>
    %78 = arith.andi %65, %77 : vector<1x128xi1>
    %79 = vector.extract_strided_slice %2 {offsets = [0, 127], sizes = [2, 1], strides = [1, 1]} : vector<2x128xf32> to vector<2x1xf32>
    %80 = vector.extract_strided_slice %2 {offsets = [0, 0], sizes = [2, 127], strides = [1, 1]} : vector<2x128xf32> to vector<2x127xf32>
    %81 = tpu.concatenate %79, %80 in 1 : vector<2x1xf32>, vector<2x127xf32> -> vector<2x128xf32>
    %cst_16 = arith.constant 0.000000e+00 : f32
    %82 = vector.shape_cast %78 : vector<1x128xi1> to vector<1x128xi1>
    %83 = vector.broadcast %82 : vector<1x128xi1> to vector<2x128xi1>
    %84 = vector.broadcast %cst_16 : f32 to vector<2x128xf32>
    %85 = arith.select %83, %81, %84 : vector<2x128xi1>, vector<2x128xf32>
    %86 = arith.addf %58, %85 : vector<2x128xf32>
    %c1_i32_17 = arith.constant 1 : i32
    %87 = vector.broadcast %c1_i32_17 : i32 to vector<1x128xi32>
    %88 = arith.addi %19, %87 : vector<1x128xi32>
    %c0_i32_18 = arith.constant 0 : i32
    %89 = vector.broadcast %c0_i32_18 : i32 to vector<1x128xi32>
    %90 = arith.cmpi sge, %88, %89 : vector<1x128xi32>
    %c7_i32_19 = arith.constant 7 : i32
    %91 = vector.broadcast %c7_i32_19 : i32 to vector<1x128xi32>
    %92 = arith.cmpi sle, %88, %91 : vector<1x128xi32>
    %93 = arith.andi %90, %92 : vector<1x128xi1>
    %c0_i32_20 = arith.constant 0 : i32
    %94 = vector.broadcast %c0_i32_20 : i32 to vector<1x128xi32>
    %95 = arith.cmpi sgt, %88, %94 : vector<1x128xi32>
    %96 = arith.extui %95 : vector<1x128xi1> to vector<1x128xi32>
    %c3_i32_21 = arith.constant 3 : i32
    %97 = vector.broadcast %c3_i32_21 : i32 to vector<1x128xi32>
    %98 = arith.cmpi sgt, %88, %97 : vector<1x128xi32>
    %99 = arith.extui %98 : vector<1x128xi1> to vector<1x128xi32>
    %100 = arith.addi %96, %99 : vector<1x128xi32>
    %c6_i32_22 = arith.constant 6 : i32
    %101 = vector.broadcast %c6_i32_22 : i32 to vector<1x128xi32>
    %102 = arith.cmpi sgt, %88, %101 : vector<1x128xi32>
    %103 = arith.extui %102 : vector<1x128xi1> to vector<1x128xi32>
    %104 = arith.addi %100, %103 : vector<1x128xi32>
    %105 = arith.cmpi eq, %30, %104 : vector<1x128xi32>
    %106 = arith.andi %93, %105 : vector<1x128xi1>
    %107 = vector.extract_strided_slice %2 {offsets = [0, 1], sizes = [2, 127], strides = [1, 1]} : vector<2x128xf32> to vector<2x127xf32>
    %108 = vector.extract_strided_slice %2 {offsets = [0, 0], sizes = [2, 1], strides = [1, 1]} : vector<2x128xf32> to vector<2x1xf32>
    %109 = tpu.concatenate %107, %108 in 1 : vector<2x127xf32>, vector<2x1xf32> -> vector<2x128xf32>
    %cst_23 = arith.constant 0.000000e+00 : f32
    %110 = vector.shape_cast %106 : vector<1x128xi1> to vector<1x128xi1>
    %111 = vector.broadcast %110 : vector<1x128xi1> to vector<2x128xi1>
    %112 = vector.broadcast %cst_23 : f32 to vector<2x128xf32>
    %113 = arith.select %111, %109, %112 : vector<2x128xi1>, vector<2x128xf32>
    %114 = arith.addf %86, %113 : vector<2x128xf32>
    %c2_i32 = arith.constant 2 : i32
    %115 = vector.broadcast %c2_i32 : i32 to vector<1x128xi32>
    %116 = arith.addi %19, %115 : vector<1x128xi32>
    %c0_i32_24 = arith.constant 0 : i32
    %117 = vector.broadcast %c0_i32_24 : i32 to vector<1x128xi32>
    %118 = arith.cmpi sge, %116, %117 : vector<1x128xi32>
    %c7_i32_25 = arith.constant 7 : i32
    %119 = vector.broadcast %c7_i32_25 : i32 to vector<1x128xi32>
    %120 = arith.cmpi sle, %116, %119 : vector<1x128xi32>
    %121 = arith.andi %118, %120 : vector<1x128xi1>
    %c0_i32_26 = arith.constant 0 : i32
    %122 = vector.broadcast %c0_i32_26 : i32 to vector<1x128xi32>
    %123 = arith.cmpi sgt, %116, %122 : vector<1x128xi32>
    %124 = arith.extui %123 : vector<1x128xi1> to vector<1x128xi32>
    %c3_i32_27 = arith.constant 3 : i32
    %125 = vector.broadcast %c3_i32_27 : i32 to vector<1x128xi32>
    %126 = arith.cmpi sgt, %116, %125 : vector<1x128xi32>
    %127 = arith.extui %126 : vector<1x128xi1> to vector<1x128xi32>
    %128 = arith.addi %124, %127 : vector<1x128xi32>
    %c6_i32_28 = arith.constant 6 : i32
    %129 = vector.broadcast %c6_i32_28 : i32 to vector<1x128xi32>
    %130 = arith.cmpi sgt, %116, %129 : vector<1x128xi32>
    %131 = arith.extui %130 : vector<1x128xi1> to vector<1x128xi32>
    %132 = arith.addi %128, %131 : vector<1x128xi32>
    %133 = arith.cmpi eq, %30, %132 : vector<1x128xi32>
    %134 = arith.andi %121, %133 : vector<1x128xi1>
    %135 = vector.extract_strided_slice %2 {offsets = [0, 2], sizes = [2, 126], strides = [1, 1]} : vector<2x128xf32> to vector<2x126xf32>
    %136 = vector.extract_strided_slice %2 {offsets = [0, 0], sizes = [2, 2], strides = [1, 1]} : vector<2x128xf32> to vector<2x2xf32>
    %137 = tpu.concatenate %135, %136 in 1 : vector<2x126xf32>, vector<2x2xf32> -> vector<2x128xf32>
    %cst_29 = arith.constant 0.000000e+00 : f32
    %138 = vector.shape_cast %134 : vector<1x128xi1> to vector<1x128xi1>
    %139 = vector.broadcast %138 : vector<1x128xi1> to vector<2x128xi1>
    %140 = vector.broadcast %cst_29 : f32 to vector<2x128xf32>
    %141 = arith.select %139, %137, %140 : vector<2x128xi1>, vector<2x128xf32>
    %142 = arith.addf %114, %141 : vector<2x128xf32>
    %143 = math.absf %142 : vector<2x128xf32>
    %144 = math.sqrt %143 : vector<2x128xf32>
    %cst_30 = arith.constant 1.000000e+00 : f32
    %145 = vector.broadcast %cst_30 : f32 to vector<2x128xf32>
    %146 = arith.subf %144, %145 : vector<2x128xf32>
    %147 = vector.broadcast %1 : vector<1x128xf32> to vector<2x128xf32>
    %148 = arith.mulf %147, %146 : vector<2x128xf32>
    %cst_31 = arith.constant 1.000000e+00 : f32
    %149 = vector.broadcast %cst_31 : f32 to vector<2x128xf32>
    %150 = arith.addf %148, %149 : vector<2x128xf32>
    %cst_32 = arith.constant 9.99999997E-7 : f32
    %151 = vector.broadcast %cst_32 : f32 to vector<2x128xf32>
    %152 = arith.addf %150, %151 : vector<2x128xf32>
    %153 = tpu.reciprocal %152 : vector<2x128xf32> -> vector<2x128xf32>
    %154 = arith.mulf %0, %153 : vector<2x128xf32>
    %c0_33 = arith.constant 0 : index
    %c0_34 = arith.constant 0 : index
    %155 = vector.load %arg4[%c0_33, %c0_34] : memref<2x128xf32, #tpu.memory_space<vmem>>, vector<2x128xf32>
    tpu.vector_store %arg4[%c0_33, %c0_34], %154 {strides = array<i32>} : memref<2x128xf32, #tpu.memory_space<vmem>>, vector<2x128xf32>,
    return
  }
  func.func @transform_0(%arg0: i32, %arg1: i32) -> (i32, i32) {
    %c0_i32 = arith.constant 0 : i32
    return %arg0, %arg1 : i32, i32
  }
  func.func @transform_1(%arg0: i32, %arg1: i32) -> (i32, i32) {
    %c0_i32 = arith.constant 0 : i32
    %c0_i32_0 = arith.constant 0 : i32
    return %c0_i32, %arg1 : i32, i32
  }
  func.func @transform_2(%arg0: i32, %arg1: i32) -> (i32, i32) {
    %c0_i32 = arith.constant 0 : i32
    return %arg0, %arg1 : i32, i32
  }
}

</mosaic_0001>

<bundles_post_ra>
// kernel: normalization_layer.1
= control target key start
LH: loop header
LB: loop body
LE: loop exit
PB: predicated region body
PF: predicated region fallthrough
CT: control target
= control target key end

     0   :  { %s157_s11 = smov 2   ;;  %s158_s12 = smov 127   ;;  %v14_v2 = vlaneseq  ;;  %v161_v8 = vmov 0   ;;  %s191_s0 = inlined_call_operand.vmem [shape: f32[2,128], index: 0, kind: input, shape index: {}]   ;;  %s192_s1 = inlined_call_operand.vmem [shape: f32[1,128], index: 1, kind: input, shape index: {}]   ;;  %s193_s2 = inlined_call_operand.vmem [shape: f32[2,128], index: 2, kind: output, shape index: {}]  }
   0x1   :  { %v180_v0 = vld [vmem:[%s191_s0] sm:$0x3]  ;;  %s159_s13 = smov 1   ;;  %s160_s14 = smov 126  }
   0x2   :  { %v13_v1 = vmul.f32 %v180_v0, %v180_v0  ;;  %v15_v3 = vand.u32 127, %v14_v2  ;;  %v147_v46 = vld [vmem:[%s192_s1] ss:$0 sm:$0xff] }
   0x4   :  { %51 = vrot.lane.b32.xlu0 %v13_v1, %s157_s11  ;;  %93 = vrot.lane.b32.xlu1 %v13_v1, %s158_s12  ;;  %v20_v4 = vand.u32 7, %v15_v3 }
   0x6   :  { %vm28_vm0 = vcmp.gt.s32.totalorder %v20_v4, 0  ;;  %vm30_vm1 = vcmp.gt.s32.totalorder %v20_v4, 3  ;;  %v36_v5 = vadd.s32 4294967294, %v20_v4  ;;  %v79_v6 = vadd.s32 1, %v20_v4 }
   0x7   :  { %v100_v7 = vadd.s32 2, %v20_v4  ;;  %v29_v9 = vsel %vm28_vm0, 1, %v161_v8  ;;  %v31_v10 = vsel %vm30_vm1, 1, %v161_v8  ;;  %vm33_vm2 = vcmp.gt.s32.totalorder %v20_v4, 6 }
   0x8   :  { %72 = vrot.lane.b32.xlu0 %v13_v1, %s159_s13  ;;  %114 = vrot.lane.b32.xlu1 %v13_v1, %s160_s14  ;;  %vm40_vm3 = vcmp.gt.s32.totalorder %v36_v5, 0  ;;  %vm42_vm4 = vcmp.gt.s32.totalorder %v36_v5, 3  ;;  %v58_v11 = vadd.s32 4294967295, %v20_v4  ;;  %vm85_vm5 = vcmp.gt.s32.totalorder %v79_v6, 3 }
   0x9   :  { %v32_v12 = vadd.s32 %v31_v10, %v29_v9  ;;  %vm106_vm6 = vcmp.gt.s32.totalorder %v100_v7, 3  ;;  %v34_v13 = vsel %vm33_vm2, 1, %v161_v8  ;;  %v41_v14 = vsel %vm40_vm3, 1, %v161_v8 }
   0xa   :  { %v43_v15 = vsel %vm42_vm4, 1, %v161_v8  ;;  %v86_v16 = vsel %vm85_vm5, 1, %v161_v8  ;;  %vm62_vm7 = vcmp.gt.s32.totalorder %v58_v11, 0  ;;  %vm64_vm8 = vcmp.gt.s32.totalorder %v58_v11, 3 }
   0xb   :  { %vm88_vm9 = vcmp.gt.s32.totalorder %v79_v6, 6  ;;  %v107_v17 = vsel %vm106_vm6, 1, %v161_v8  ;;  %v35_v18 = vadd.s32 %v34_v13, %v32_v12  ;;  %v44_v19 = vadd.s32 %v43_v15, %v41_v14 }
   0xc   :  { %vm109_vm10 = vcmp.gt.s32.totalorder %v100_v7, 6  ;;  %v87_v20 = vadd.s32 1, %v86_v16  ;;  %v63_v21 = vsel %vm62_vm7, 1, %v161_v8  ;;  %v65_v22 = vsel %vm64_vm8, 1, %v161_v8 }
   0xd   :  { %v89_v23 = vsel %vm88_vm9, 1, %v161_v8  ;;  %v108_v24 = vadd.s32 1, %v107_v17  ;;  %v110_v25 = vsel %vm109_vm10, 1, %v161_v8  ;;  %vm37_vm11 = vcmp.ge.s32.totalorder %v36_v5, 0 }
   0xe   :  { %vm48_vm12 = vcmp.eq.s32.totalorder %v35_v18, %v44_v19  ;;  %v66_v26 = vadd.s32 %v65_v22, %v63_v21  ;;  %v90_v27 = vadd.s32 %v89_v23, %v87_v20  ;;  %vm59_vm14 = vcmp.ge.s32.totalorder %v58_v11, 0 }
   0xf   :  { %v111_v28 = vadd.s32 %v110_v25, %v108_v24  ;;  %vm49_vm13 = vmand %vm37_vm11, %vm48_vm12  ;;  %vm81_vm0 = vcmp.le.s32.totalorder %v79_v6, 7  ;;  %vm102_vm2 = vcmp.le.s32.totalorder %v100_v7, 7 }
  0x10   :  { %vm70_vm15 = vcmp.eq.s32.totalorder %v35_v18, %v66_v26  ;;  %vm91_vm1 = vcmp.eq.s32.totalorder %v35_v18, %v90_v27 }
  0x11   :  { %vm112_vm3 = vcmp.eq.s32.totalorder %v35_v18, %v111_v28  ;;  %vm71_vm4 = vmand %vm59_vm14, %vm70_vm15 }
  0x12   :  { %vm92_vm5 = vmand %vm81_vm0, %vm91_vm1 }
  0x13   :  { %vm113_vm6 = vmand %vm102_vm2, %vm112_vm3 }
  0x76   :  { %v52_v29 = vpop.permute.xlu0 %51  ;;  %v94_v30 = vpop.permute.xlu1 %93 }
  0x77   :  { %v56_v31 = vsel %vm49_vm13, %v52_v29, 0.0  ;;  %v98_v37 = vsel %vm92_vm5, %v94_v30, 0.0 }
  0x78   :  { %v57_v32 = vadd.f32 %v56_v31, %v13_v1 }
  0x7a   :  { %v73_v33 = vpop.permute.xlu0 %72  ;;  %v115_v34 = vpop.permute.xlu1 %114 }
  0x7b   :  { %v77_v35 = vsel %vm71_vm4, %v73_v33, 0.0  ;;  %v119_v38 = vsel %vm113_vm6, %v115_v34, 0.0 }
  0x7c   :  { %v78_v36 = vadd.f32 %v77_v35, %v57_v32 }
  0x7e   :  { %v99_v39 = vadd.f32 %v98_v37, %v78_v36 }
  0x80   :  { %v120_v40 = vadd.f32 %v119_v38, %v99_v39 }
  0x82   :  { %v121_v41 = vand.u32 2147483647, %v120_v40 }
  0x84   :  { %153 = vrsqrt.f32 %v121_v41  ;;  %vm124_vm7 = vcmp.eq.f32.partialorder %v121_v41, inf  ;;  %v127_v44 = vand.u32 2147483648, %v121_v41  ;;  %vm126_vm8 = vcmp.eq.f32.partialorder %v121_v41, 0.0 }
  0x8e   :  { %v154_v42 = vpop.eup %153 }
  0x8f   :  { %v123_v43 = vmul.f32 %v154_v42, %v121_v41 }
  0x91   :  { %v125_v45 = vsel %vm124_vm7, %v121_v41, %v123_v43 }
  0x92   :  { %v128_v47 = vsel %vm126_vm8, %v127_v44, %v125_v45 }
  0x93   :  { %v146_v48 = vadd.f32 -1.0, %v128_v47 }
  0x95   :  { %v136_v49 = vmul.f32 %v147_v46, %v146_v48 }
  0x97   :  { %v137_v50 = vadd.f32 1.0, %v136_v49 }
  0x99   :  { %v138_v51 = vadd.f32 1e-06, %v137_v50 }
  0x9b   :  { %155 = vrcp.f32 %v138_v51 }
  0xa5   :  { %v156_v52 = vpop.eup %155 }
  0xa6   :  { %v140_v53 = vmul.f32 %v156_v52, %v180_v0 }
  0xa8   :  { %141 = vst [vmem:[%s193_s2] sm:$0x3] %v140_v53 }

</bundles_post_ra>
